<compile_context>
chip_gen: v6e
topology: v6e:2x2x1
jax: 0.10.0
libtpu: 0.0.40
codegen_flags: <defaults>
</compile_context>

<pallas_src>
import functools
import jax
import jax.numpy as jnp
from jax.experimental import pallas as pl
from jax.experimental.pallas import tpu as pltpu


def _erf_f32(x):
    """float32 erf via XLA/Eigen rational approximation (mul/add + EUP recip)."""
    a = (-2.72614225801306e-10, 2.77068142495902e-08, -2.10102402082508e-06,
         -5.69250639462346e-05, -7.34990630326855e-04, -2.95459980854025e-03,
         -1.60960333262415e-02)
    b = (-1.45660718464996e-05, -2.13374055278905e-04, -1.68282697438203e-03,
         -7.37332916720468e-03, -1.42647390514189e-02)
    x = jnp.clip(x, -4.0, 4.0)
    x2 = x * x
    p = jnp.full_like(x2, a[0])
    for c in a[1:]:
        p = p * x2 + c
    q = jnp.full_like(x2, b[0])
    for c in b[1:]:
        q = q * x2 + c
    # Divide -> EUP approximate reciprocal (frees the VALU slot).
    return x * p * pl.reciprocal(q, approx=True)


def _gelu_exact(x):
    # torch.nn.GELU() default: exact erf form.
    return 0.5 * x * (1.0 + _erf_f32(x * 0.7071067811865476))


def vit_kernel(xpT_ref, wf_ref, bz_ref, pos_ref, gamma_ref, beta_ref,
               wh_ref, bh_ref, out_ref):
    # xpT_ref: (1, C*P2, N) bf16 patch tokens (token axis on lanes).
    # wf_ref : (D, C*P2)    bf16 fused depthwise+pointwise weight.
    # Fused embedding: one MXU matmul with f32 accumulation.
    zT = jnp.dot(wf_ref[...], xpT_ref[0],
                 preferred_element_type=jnp.float32)          # (D, N) f32
    zT = zT + bz_ref[...]                                     # fused bias (D, 1)

    # GELU (exact / erf form, matching torch.nn.GELU default).
    zT = _gelu_exact(zT)

    # Positional bias (pre-flattened to (D, N) in the wrapper).
    zT = zT + pos_ref[...]

    # Dropout p=0.0 -> identity.
    # TODO(synk): FC_TransformerBlock stack not defined in source -> identity.

    # LayerNorm over the full (D, H', W') slab of this batch element (eps=1e-5).
    mu = jnp.mean(zT)
    var = jnp.mean((zT - mu) * (zT - mu))
    zn = (zT - mu) * jax.lax.rsqrt(var + 1e-5)
    zn = zn * gamma_ref[...] + beta_ref[...]                  # (D, N)

    # Denoising head: 1x1 conv D -> 3 as (3, D) @ (D, N); lane-dense store.
    out = jnp.dot(wh_ref[...], zn, preferred_element_type=jnp.float32)
    out_ref[0] = out + bh_ref[...]                            # (3, N)


@functools.partial(jax.jit, static_argnames=("patch",))
def vit_forward(x, params, patch):
    B, C, H, W = x.shape
    p = patch
    Hp, Wp = H // p, W // p
    N = Hp * Wp
    P2 = p * p
    CP2 = C * P2

    dw = params["dw_w"].reshape(C, P2)                        # (C, p*p)
    pw = params["pw_w"].reshape(-1, C)                        # (D, C)
    D = pw.shape[0]

    # Fused depthwise + pointwise weight / bias (computed in f32).
    wf = (pw[:, :, None] * dw[None, :, :]).reshape(D, CP2)    # (D, C*p*p)
    bz = (pw @ params["dw_b"] + params["pw_b"]).reshape(D, 1)  # (D, 1)

    # (D, Hp, Wp) params flatten straight into the (D, N) token-on-lane layout.
    posT = params["pos"].reshape(D, N)
    gammaT = params["ln_w"].reshape(D, N)
    betaT = params["ln_b"].reshape(D, N)
    wh = params["head_w"].reshape(3, D)                       # (3, D)
    bh = params["head_b"].reshape(3, 1)                       # (3, 1)

    # NCHW -> (B, C*p*p, N) patch tokens, token index n = h'*Wp + w'.
    # (At production sizes this extraction could be folded into the kernel's
    # own DMA via a (B, Hp) grid and a (1, C, p, W) input BlockSpec.)
    xpT = (x.reshape(B, C, Hp, p, Wp, p)
            .transpose(0, 1, 3, 5, 2, 4)
            .reshape(B, CP2, N))

    # bf16 MXU operands; accumulation stays f32 inside the kernel.
    xpT = xpT.astype(jnp.bfloat16)
    wf = wf.astype(jnp.bfloat16)

    out_tok = pl.pallas_call(
        vit_kernel,
        out_shape=jax.ShapeDtypeStruct((B, 3, N), jnp.float32),
        grid=(B,),
        in_specs=[
            pl.BlockSpec((1, CP2, N), lambda b: (b, 0, 0)),   # patch tokens
            pl.BlockSpec((D, CP2), lambda b: (0, 0)),         # fused weight
            pl.BlockSpec((D, 1), lambda b: (0, 0)),           # fused bias
            pl.BlockSpec((D, N), lambda b: (0, 0)),           # positional bias
            pl.BlockSpec((D, N), lambda b: (0, 0)),           # LN gamma
            pl.BlockSpec((D, N), lambda b: (0, 0)),           # LN beta
            pl.BlockSpec((3, D), lambda b: (0, 0)),           # head weight
            pl.BlockSpec((3, 1), lambda b: (0, 0)),           # head bias
        ],
        out_specs=pl.BlockSpec((1, 3, N), lambda b: (b, 0, 0)),
        compiler_params=pltpu.CompilerParams(
            dimension_semantics=("parallel",),
            vmem_limit_bytes=32 * 1024 * 1024),
    )(xpT, wf, bz, posT, gammaT, betaT, wh, bh)

    # (B, 3, N) is already channel-major: reshape straight to (B, 3, H', W').
    return out_tok.reshape(B, 3, Hp, Wp)


def vit_reference(x, params, patch):
    """Pure-JAX f32 reference (exact erf) for a sanity check."""
    B, C, H, W = x.shape
    p = patch
    Hp, Wp = H // p, W // p
    N = Hp * Wp
    xp = (x.reshape(B, C, Hp, p, Wp, p)
           .transpose(0, 2, 4, 1, 3, 5)
           .reshape(B, N, C, p * p))
    y = jnp.einsum("bnck,ck->bnc", xp, params["dw_w"].reshape(C, p * p))
    y = y + params["dw_b"][None, None, :]
    D = params["pw_w"].shape[0]
    z = jnp.einsum("bnc,dc->bnd", y, params["pw_w"].reshape(D, C)) + params["pw_b"]
    z = 0.5 * z * (1.0 + jax.scipy.special.erf(z / jnp.sqrt(2.0)))
    pos = params["pos"].transpose(1, 2, 0).reshape(N, D)
    z = z + pos[None]
    mu = jnp.mean(z, axis=(1, 2), keepdims=True)
    var = jnp.mean((z - mu) ** 2, axis=(1, 2), keepdims=True)
    zn = (z - mu) / jnp.sqrt(var + 1e-5)
    zn = zn * params["ln_w"].transpose(1, 2, 0).reshape(1, N, D)
    zn = zn + params["ln_b"].transpose(1, 2, 0).reshape(1, N, D)
    out = jnp.einsum("bnd,od->bno", zn, params["head_w"].reshape(3, D)) + params["head_b"]
    return out.reshape(B, Hp, Wp, 3).transpose(0, 3, 1, 2)


if __name__ == "__main__":
    # Small shapes consistent with the module (embed_dim scaled down):
    B, C = 2, 3
    H = W = 32                   # module default input_resolution
    PATCH = 4                    # module default patch_width
    D = 32                       # embed_dim (scaled down from 256)
    Hp, Wp = H // PATCH, W // PATCH

    key = jax.random.PRNGKey(0)
    ks = jax.random.split(key, 10)
    params = {
        "dw_w":   0.1 * jax.random.normal(ks[0], (C, 1, PATCH, PATCH), jnp.float32),
        "dw_b":   0.1 * jax.random.normal(ks[1], (C,), jnp.float32),
        "pw_w":   0.1 * jax.random.normal(ks[2], (D, C, 1, 1), jnp.float32),
        "pw_b":   0.1 * jax.random.normal(ks[3], (D,), jnp.float32),
        "pos":          jax.random.normal(ks[4], (D, Hp, Wp), jnp.float32),
        "ln_w":   1.0 + 0.1 * jax.random.normal(ks[5], (D, Hp, Wp), jnp.float32),
        "ln_b":   0.1 * jax.random.normal(ks[6], (D, Hp, Wp), jnp.float32),
        "head_w": 0.1 * jax.random.normal(ks[7], (3, D, 1, 1), jnp.float32),
        "head_b": 0.1 * jax.random.normal(ks[8], (3,), jnp.float32),
    }
    x = jax.random.normal(ks[9], (B, C, H, W), jnp.float32)

    out = vit_forward(x, params, PATCH)
    out = jax.block_until_ready(out)

    ref = vit_reference(x, params, PATCH)
    assert out.shape == (B, 3, Hp, Wp), out.shape
    # bf16 operands on the embedding matmul + approx-erf GELU -> ~1e-3 level
    # deviation from the exact-f32 reference; 1e-2 is a comfortable bound.
    assert jnp.allclose(out, ref, rtol=1e-2, atol=1e-2), \
        float(jnp.max(jnp.abs(out - ref)))

    print("KERNEL_OK")
</pallas_src>

<mosaic_0001>
module attributes {stable_mosaic.version = 11 : i64} {
  func.func @vit_kernel(%arg0: i32, %arg1: memref<1x48x64xbf16, #tpu.memory_space<vmem>>, %arg2: memref<32x48xbf16, #tpu.memory_space<vmem>>, %arg3: memref<32x1xf32, #tpu.memory_space<vmem>>, %arg4: memref<32x64xf32, #tpu.memory_space<vmem>>, %arg5: memref<32x64xf32, #tpu.memory_space<vmem>>, %arg6: memref<32x64xf32, #tpu.memory_space<vmem>>, %arg7: memref<3x32xf32, #tpu.memory_space<vmem>>, %arg8: memref<3x1xf32, #tpu.memory_space<vmem>>, %arg9: memref<1x3x64xf32, #tpu.memory_space<vmem>>) attributes {dimension_semantics = [#tpu.dimension_semantics<parallel>], iteration_bounds = array<i64: 2>, scalar_prefetch = 0 : i64, scratch_operands = 0 : i64, tpu.core_type = #tpu.core_type<tc>, window_params = [{transform_indices = @transform_0, window_bounds = array<i64: 1, 48, 64>}, {pipeline_mode = #tpu.pipeline_mode<synchronous>, transform_indices = @transform_1, window_bounds = array<i64: 32, 48>}, {pipeline_mode = #tpu.pipeline_mode<synchronous>, transform_indices = @transform_2, window_bounds = array<i64: 32, 1>}, {pipeline_mode = #tpu.pipeline_mode<synchronous>, transform_indices = @transform_3, window_bounds = array<i64: 32, 64>}, {pipeline_mode = #tpu.pipeline_mode<synchronous>, transform_indices = @transform_4, window_bounds = array<i64: 32, 64>}, {pipeline_mode = #tpu.pipeline_mode<synchronous>, transform_indices = @transform_5, window_bounds = array<i64: 32, 64>}, {pipeline_mode = #tpu.pipeline_mode<synchronous>, transform_indices = @transform_6, window_bounds = array<i64: 3, 32>}, {pipeline_mode = #tpu.pipeline_mode<synchronous>, transform_indices = @transform_7, window_bounds = array<i64: 3, 1>}, {transform_indices = @transform_8, window_bounds = array<i64: 1, 3, 64>}]} {
    %c0 = arith.constant 0 : index
    %c0_0 = arith.constant 0 : index
    %0 = vector.load %arg2[%c0, %c0_0] : memref<32x48xbf16, #tpu.memory_space<vmem>>, vector<32x48xbf16>
    %c0_1 = arith.constant 0 : index
    %c0_2 = arith.constant 0 : index
    %c0_3 = arith.constant 0 : index
    %1 = vector.load %arg1[%c0_1, %c0_2, %c0_3] : memref<1x48x64xbf16, #tpu.memory_space<vmem>>, vector<1x48x64xbf16>
    %2 = vector.shape_cast %1 : vector<1x48x64xbf16> to vector<48x64xbf16>
    %cst = arith.constant dense<0.000000e+00> : vector<32x64xf32>
    %3 = tpu.matmul %0, %2, %cst {dimension_numbers = #tpu.dot_dimension_numbers<[1], [0], [0], [1], [0, 0, 1, 1], [], []>} : vector<32x48xbf16>, vector<48x64xbf16>, vector<32x64xf32> -> vector<32x64xf32>
    %c0_4 = arith.constant 0 : index
    %c0_5 = arith.constant 0 : index
    %4 = vector.load %arg3[%c0_4, %c0_5] : memref<32x1xf32, #tpu.memory_space<vmem>>, vector<32x1xf32>
    %5 = vector.broadcast %4 : vector<32x1xf32> to vector<32x64xf32>
    %6 = arith.addf %3, %5 : vector<32x64xf32>
    %cst_6 = arith.constant 5.000000e-01 : f32
    %7 = vector.broadcast %cst_6 : f32 to vector<32x64xf32>
    %8 = arith.mulf %7, %6 : vector<32x64xf32>
    %cst_7 = arith.constant 0.707106769 : f32
    %9 = vector.broadcast %cst_7 : f32 to vector<32x64xf32>
    %10 = arith.mulf %6, %9 : vector<32x64xf32>
    %cst_8 = arith.constant -4.000000e+00 : f32
    %cst_9 = arith.constant 4.000000e+00 : f32
    %11 = vector.broadcast %cst_8 : f32 to vector<32x64xf32>
    %12 = arith.maximumf %11, %10 : vector<32x64xf32>
    %13 = vector.broadcast %cst_9 : f32 to vector<32x64xf32>
    %14 = arith.minimumf %13, %12 : vector<32x64xf32>
    %15 = arith.mulf %14, %14 : vector<32x64xf32>
    %cst_10 = arith.constant -2.72614237E-10 : f32
    %16 = vector.broadcast %cst_10 : f32 to vector<32x64xf32>
    %17 = arith.mulf %16, %15 : vector<32x64xf32>
    %cst_11 = arith.constant 2.77068146E-8 : f32
    %18 = vector.broadcast %cst_11 : f32 to vector<32x64xf32>
    %19 = arith.addf %17, %18 : vector<32x64xf32>
    %20 = arith.mulf %19, %15 : vector<32x64xf32>
    %cst_12 = arith.constant -2.10102394E-6 : f32
    %21 = vector.broadcast %cst_12 : f32 to vector<32x64xf32>
    %22 = arith.addf %20, %21 : vector<32x64xf32>
    %23 = arith.mulf %22, %15 : vector<32x64xf32>
    %cst_13 = arith.constant -5.69250624E-5 : f32
    %24 = vector.broadcast %cst_13 : f32 to vector<32x64xf32>
    %25 = arith.addf %23, %24 : vector<32x64xf32>
    %26 = arith.mulf %25, %15 : vector<32x64xf32>
    %cst_14 = arith.constant -7.34990637E-4 : f32
    %27 = vector.broadcast %cst_14 : f32 to vector<32x64xf32>
    %28 = arith.addf %26, %27 : vector<32x64xf32>
    %29 = arith.mulf %28, %15 : vector<32x64xf32>
    %cst_15 = arith.constant -2.954600e-03 : f32
    %30 = vector.broadcast %cst_15 : f32 to vector<32x64xf32>
    %31 = arith.addf %29, %30 : vector<32x64xf32>
    %32 = arith.mulf %31, %15 : vector<32x64xf32>
    %cst_16 = arith.constant -0.0160960332 : f32
    %33 = vector.broadcast %cst_16 : f32 to vector<32x64xf32>
    %34 = arith.addf %32, %33 : vector<32x64xf32>
    %cst_17 = arith.constant -1.45660715E-5 : f32
    %35 = vector.broadcast %cst_17 : f32 to vector<32x64xf32>
    %36 = arith.mulf %35, %15 : vector<32x64xf32>
    %cst_18 = arith.constant -2.13374049E-4 : f32
    %37 = vector.broadcast %cst_18 : f32 to vector<32x64xf32>
    %38 = arith.addf %36, %37 : vector<32x64xf32>
    %39 = arith.mulf %38, %15 : vector<32x64xf32>
    %cst_19 = arith.constant -0.00168282702 : f32
    %40 = vector.broadcast %cst_19 : f32 to vector<32x64xf32>
    %41 = arith.addf %39, %40 : vector<32x64xf32>
    %42 = arith.mulf %41, %15 : vector<32x64xf32>
    %cst_20 = arith.constant -0.00737332925 : f32
    %43 = vector.broadcast %cst_20 : f32 to vector<32x64xf32>
    %44 = arith.addf %42, %43 : vector<32x64xf32>
    %45 = arith.mulf %44, %15 : vector<32x64xf32>
    %cst_21 = arith.constant -0.0142647391 : f32
    %46 = vector.broadcast %cst_21 : f32 to vector<32x64xf32>
    %47 = arith.addf %45, %46 : vector<32x64xf32>
    %48 = arith.mulf %14, %34 : vector<32x64xf32>
    %49 = tpu.reciprocal %47 {approx = true} : vector<32x64xf32> -> vector<32x64xf32>
    %50 = arith.mulf %48, %49 : vector<32x64xf32>
    %cst_22 = arith.constant 1.000000e+00 : f32
    %51 = vector.broadcast %cst_22 : f32 to vector<32x64xf32>
    %52 = arith.addf %51, %50 : vector<32x64xf32>
    %53 = arith.mulf %8, %52 : vector<32x64xf32>
    %c0_23 = arith.constant 0 : index
    %c0_24 = arith.constant 0 : index
    %54 = vector.load %arg4[%c0_23, %c0_24] : memref<32x64xf32, #tpu.memory_space<vmem>>, vector<32x64xf32>
    %55 = arith.addf %53, %54 : vector<32x64xf32>
    %56 = vector.shape_cast %55 : vector<32x64xf32> to vector<1x32x64xf32>
    %cst_25 = arith.constant dense<0.000000e+00> : vector<1xf32>
    %57 = vector.multi_reduction <add>, %56, %cst_25 [1, 2] : vector<1x32x64xf32> to vector<1xf32>
    %58 = vector.shape_cast %57 : vector<1xf32> to vector<1x1x1xf32>
    %59 = vector.extract %58[0, 0, 0] : f32 from vector<1x1x1xf32>
    %cst_26 = arith.constant 2.048000e+03 : f32
    %60 = arith.divf %59, %cst_26 : f32
    %61 = vector.broadcast %60 : f32 to vector<32x64xf32>
    %62 = arith.subf %55, %61 : vector<32x64xf32>
    %63 = vector.broadcast %60 : f32 to vector<32x64xf32>
    %64 = arith.subf %55, %63 : vector<32x64xf32>
    %65 = arith.mulf %62, %64 : vector<32x64xf32>
    %66 = vector.shape_cast %65 : vector<32x64xf32> to vector<1x32x64xf32>
    %cst_27 = arith.constant dense<0.000000e+00> : vector<1xf32>
    %67 = vector.multi_reduction <add>, %66, %cst_27 [1, 2] : vector<1x32x64xf32> to vector<1xf32>
    %68 = vector.shape_cast %67 : vector<1xf32> to vector<1x1x1xf32>
    %69 = vector.extract %68[0, 0, 0] : f32 from vector<1x1x1xf32>
    %cst_28 = arith.constant 2.048000e+03 : f32
    %70 = arith.divf %69, %cst_28 : f32
    %71 = vector.broadcast %60 : f32 to vector<32x64xf32>
    %72 = arith.subf %55, %71 : vector<32x64xf32>
    %cst_29 = arith.constant 9.99999974E-6 : f32
    %73 = arith.addf %70, %cst_29 : f32
    %74 = math.rsqrt %73 : f32
    %75 = vector.broadcast %74 : f32 to vector<32x64xf32>
    %76 = arith.mulf %72, %75 : vector<32x64xf32>
    %c0_30 = arith.constant 0 : index
    %c0_31 = arith.constant 0 : index
    %77 = vector.load %arg5[%c0_30, %c0_31] : memref<32x64xf32, #tpu.memory_space<vmem>>, vector<32x64xf32>
    %78 = arith.mulf %76, %77 : vector<32x64xf32>
    %c0_32 = arith.constant 0 : index
    %c0_33 = arith.constant 0 : index
    %79 = vector.load %arg6[%c0_32, %c0_33] : memref<32x64xf32, #tpu.memory_space<vmem>>, vector<32x64xf32>
    %80 = arith.addf %78, %79 : vector<32x64xf32>
    %c0_34 = arith.constant 0 : index
    %c0_35 = arith.constant 0 : index
    %81 = vector.load %arg7[%c0_34, %c0_35] : memref<3x32xf32, #tpu.memory_space<vmem>>, vector<3x32xf32>
    %cst_36 = arith.constant dense<0.000000e+00> : vector<3x64xf32>
    %82 = tpu.matmul %81, %80, %cst_36 {dimension_numbers = #tpu.dot_dimension_numbers<[1], [0], [0], [1], [0, 0, 1, 1], [], []>} : vector<3x32xf32>, vector<32x64xf32>, vector<3x64xf32> -> vector<3x64xf32>
    %c0_37 = arith.constant 0 : index
    %c0_38 = arith.constant 0 : index
    %83 = vector.load %arg8[%c0_37, %c0_38] : memref<3x1xf32, #tpu.memory_space<vmem>>, vector<3x1xf32>
    %84 = vector.broadcast %83 : vector<3x1xf32> to vector<3x64xf32>
    %85 = arith.addf %82, %84 : vector<3x64xf32>
    %c0_39 = arith.constant 0 : index
    %c0_40 = arith.constant 0 : index
    %c0_41 = arith.constant 0 : index
    %86 = vector.load %arg9[%c0_39, %c0_40, %c0_41] : memref<1x3x64xf32, #tpu.memory_space<vmem>>, vector<1x3x64xf32>
    %87 = vector.shape_cast %86 : vector<1x3x64xf32> to vector<3x64xf32>
    %88 = vector.shape_cast %85 : vector<3x64xf32> to vector<1x3x64xf32>
    tpu.vector_store %arg9[%c0_39, %c0_40, %c0_41], %88 {strides = array<i32>} : memref<1x3x64xf32, #tpu.memory_space<vmem>>, vector<1x3x64xf32>,
    return
  }
  func.func @transform_0(%arg0: i32) -> (i32, i32, i32) {
    %c0_i32 = arith.constant 0 : i32
    %c0_i32_0 = arith.constant 0 : i32
    %c0_i32_1 = arith.constant 0 : i32
    return %arg0, %c0_i32, %c0_i32_0 : i32, i32, i32
  }
  func.func @transform_1(%arg0: i32) -> (i32, i32) {
    %c0_i32 = arith.constant 0 : i32
    %c0_i32_0 = arith.constant 0 : i32
    %c0_i32_1 = arith.constant 0 : i32
    return %c0_i32, %c0_i32_0 : i32, i32
  }
  func.func @transform_2(%arg0: i32) -> (i32, i32) {
    %c0_i32 = arith.constant 0 : i32
    %c0_i32_0 = arith.constant 0 : i32
    %c0_i32_1 = arith.constant 0 : i32
    return %c0_i32, %c0_i32_0 : i32, i32
  }
  func.func @transform_3(%arg0: i32) -> (i32, i32) {
    %c0_i32 = arith.constant 0 : i32
    %c0_i32_0 = arith.constant 0 : i32
    %c0_i32_1 = arith.constant 0 : i32
    return %c0_i32, %c0_i32_0 : i32, i32
  }
  func.func @transform_4(%arg0: i32) -> (i32, i32) {
    %c0_i32 = arith.constant 0 : i32
    %c0_i32_0 = arith.constant 0 : i32
    %c0_i32_1 = arith.constant 0 : i32
    return %c0_i32, %c0_i32_0 : i32, i32
  }
  func.func @transform_5(%arg0: i32) -> (i32, i32) {
    %c0_i32 = arith.constant 0 : i32
    %c0_i32_0 = arith.constant 0 : i32
    %c0_i32_1 = arith.constant 0 : i32
    return %c0_i32, %c0_i32_0 : i32, i32
  }
  func.func @transform_6(%arg0: i32) -> (i32, i32) {
    %c0_i32 = arith.constant 0 : i32
    %c0_i32_0 = arith.constant 0 : i32
    %c0_i32_1 = arith.constant 0 : i32
    return %c0_i32, %c0_i32_0 : i32, i32
  }
  func.func @transform_7(%arg0: i32) -> (i32, i32) {
    %c0_i32 = arith.constant 0 : i32
    %c0_i32_0 = arith.constant 0 : i32
    %c0_i32_1 = arith.constant 0 : i32
    return %c0_i32, %c0_i32_0 : i32, i32
  }
  func.func @transform_8(%arg0: i32) -> (i32, i32, i32) {
    %c0_i32 = arith.constant 0 : i32
    %c0_i32_0 = arith.constant 0 : i32
    %c0_i32_1 = arith.constant 0 : i32
    return %arg0, %c0_i32, %c0_i32_0 : i32, i32, i32
  }
}

</mosaic_0001>

<bundles_post_ra>
// kernel: vit_forward.1
= control target key start
LH: loop header
LB: loop body
LE: loop exit
PB: predicated region body
PF: predicated region fallthrough
CT: control target
= control target key end

     0   :  { %s903_s27 = smov 0   ;;  %s1078_s0 = inlined_call_operand.vmem [shape: bf16[2,48,64], index: 0, kind: input, shape index: {}]   ;;  %s1079_s1 = inlined_call_operand.vmem [shape: bf16[32,48], index: 1, kind: input, shape index: {}]   ;;  %s1080_s2 = inlined_call_operand.vmem [shape: f32[32,1], index: 2, kind: input, shape index: {}]   ;;  %s1081_s3 = inlined_call_operand.vmem [shape: f32[32,64], index: 3, kind: input, shape index: {}]   ;;  %s1082_s4 = inlined_call_operand.vmem [shape: f32[32,64], index: 4, kind: input, shape index: {}]   ;;  %s1083_s5 = inlined_call_operand.vmem [shape: f32[32,64], index: 5, kind: input, shape index: {}]   ;;  %s1084_s6 = inlined_call_operand.vmem [shape: f32[3,32], index: 6, kind: input, shape index: {}]   ;;  %s1085_s7 = inlined_call_operand.vmem [shape: f32[3,1], index: 7, kind: input, shape index: {}]   ;;  %s1086_s8 = inlined_call_operand.vmem [shape: f32[2,3,64], index: 8, kind: output, shape index: {}]  }
   0x1 LB: > { %s760_s28 = sadd.s32 4294967295, %s853_s27   ;;  %p764_p0 = scmp.ge.s32.totalorder %s853_s27, 1  ;;  %s853_s27 = sphi %s903_s27, %s18_s27  }
   0x2   : > { %p262_p1 = scmp.lt.s32.totalorder %s853_s27, 3 }
   0x4   : > { %p263_p2 = pnand %p764_p0, %p262_p1 }
   0x5   : > { %p295_p3 = scmp.lt.s32.totalorder (!%p263_p2), %s760_s28, 1 }
   0x6   : > { %266 = sbr.rel (%p263_p2) target bundleno = 974 (0x3ce), region = 52 }
   0xb   : > { %v835_v0 = vld [vmem:[%s1079_s1] sm:$0xff]   ;;  %vm367_vm0 = vcmask 392192   ;;  %s1088_s28 = smov (!%p295_p3, %s760_s28), 1  ;;  %v317_v2 = vld [vmem:[%s1080_s2 + $0x10] sm:$0xff]  ;;  %v855_v3 = vmov 0   ;;  %v316_v4 = vld [vmem:[%s1080_s2 + $0x8] sm:$0xff] }
   0xc   : > { %797 = vmatprep.mubr.msk.bf16.mxu0 %vm367_vm0, %v835_v0  ;;  %v315_v1 = vld [vmem:[%s1080_s2] sm:$0xff]  ;;  %830 = vset.pattern.permute.xlu0 %v855_v3  ;;  %s812_s13 = smul.u32 24, %s1088_s28  ;;  %v318_v5 = vld [vmem:[%s1080_s2 + $0x18] sm:$0xff]  ;;  %v836_v9 = vld [vmem:[%s1079_s1 + $0x8] sm:$0xff]   ;;  %vm551_vm1 = vcmask 523264   ;;  %vm857_vm2 = vmmov 0  }
   0xd   : > { %831 = vset.pattern.permute.xlu1 %v855_v3  ;;  %321 = vperm.xlu0 %830, %v315_v1   ;;  %vm631_vm3 = vcmask 261120   ;;  %vm705_vm4 = vcmask 518144  }
   0xe   : > { %331 = vperm.xlu1 %831, %v317_v2   ;;  %s299_s20 = scalar_lea.vmem %s1078_s0, %s812_s13 }
   0xf   : > { %v832_v6 = vld [vmem:[%s299_s20 + $0x10] sm:$0xff]   ;;  %v833_v7 = vld [vmem:[%s299_s20 + $0x8] sm:$0xff]   ;;  %v834_v8 = vld [vmem:[%s299_s20] sm:$0xff]  }
  0x10   : > { %791 = vmatprep.subr.bf16.mxu0 %v832_v6 }
  0x11   : > { %326 = vperm.xlu0 %830, %v316_v4   ;;  %792 = vmatpush3.bf16.msra.mxu0 %v832_v6 }
  0x12   : > { %336 = vperm.xlu1 %831, %v318_v5   ;;  %793 = vmatprep.subr.bf16.mxu0 %v833_v7 }
  0x15   : > { %794 = vmatpush3.bf16.msra.mxu0 %v833_v7 }
  0x16   : > { %795 = vmatprep.subr.bf16.mxu0 %v834_v8 }
  0x19   : > { %796 = vmatpush3.bf16.msra.mxu0 %v834_v8 }
  0x1c   : > { %798 = vmatmul.mubr.msk.bf16.vlgmr.msra.gmra.mxu0 %vm367_vm0, %v836_v9 }
  0x88   : > { %v322_v12 = vpop.permute.xlu0 %321 }
  0x89   : > { %v332_v10 = vpop.permute.xlu1 %331 }
  0x8c   : > { %v327_v24 = vpop.permute.xlu0 %326 }
  0x8d   : > { %v337_v15 = vpop.permute.xlu1 %336 }
  0xdc   : > { %v799_v11 = vpop.f32.mrf.mxu0 }
  0xdd   : > { %v937_v13 = vadd.f32 %v799_v11, %v332_v10 }
  0xde   : > { %v408_v14 = vpop.f32.mrf.mxu0 }
  0xdf   : > { %v429_v16 = vmul.f32 0.70710677, %v937_v13  ;;  %v940_v17 = vadd.f32 %v408_v14, %v322_v12 }
  0xe0   : > { %v800_v18 = vpop.f32.mrf.mxu0 }
  0xe1   : > { %v942_v19 = vclamps-f32 %v429_v16, 4.0  ;;  %v427_v20 = vmul.f32 0.70710677, %v940_v17  ;;  %v945_v21 = vadd.f32 %v800_v18, %v337_v15 }
  0xe2   : > { %v411_v22 = vpop.f32.mrf.mxu0 }
  0xe3   : > { %v949_v23 = vmul.f32 %v942_v19, %v942_v19  ;;  %v951_v25 = vclamps-f32 %v427_v20, 4.0  ;;  %v430_v26 = vmul.f32 0.70710677, %v945_v21  ;;  %v954_v27 = vadd.f32 %v411_v22, %v327_v24 }
  0xe5   : > { %v445_v28 = vmul.f32 -2.7261424e-10, %v949_v23  ;;  %v493_v29 = vmul.f32 -1.45660715e-05, %v949_v23  ;;  %v960_v30 = vmul.f32 %v951_v25, %v951_v25  ;;  %v962_v31 = vclamps-f32 %v430_v26, 4.0 }
  0xe6   : > { %v428_v32 = vmul.f32 0.70710677, %v954_v27 }
  0xe7   : > { %v449_v33 = vadd.f32 2.7706815e-08, %v445_v28  ;;  %v497_v34 = vadd.f32 -0.00021337405, %v493_v29  ;;  %v443_v35 = vmul.f32 -2.7261424e-10, %v960_v30  ;;  %v968_v36 = vmul.f32 %v962_v31, %v962_v31 }
  0xe8   : > { %v491_v37 = vmul.f32 -1.45660715e-05, %v960_v30  ;;  %v971_v38 = vclamps-f32 %v428_v32, 4.0 }
  0xe9   : > { %v453_v39 = vmul.f32 %v449_v33, %v949_v23  ;;  %v501_v40 = vmul.f32 %v497_v34, %v949_v23  ;;  %v447_v41 = vadd.f32 2.7706815e-08, %v443_v35  ;;  %v446_v42 = vmul.f32 -2.7261424e-10, %v968_v36 }
  0xea   : > { %v495_v43 = vadd.f32 -0.00021337405, %v491_v37  ;;  %v494_v44 = vmul.f32 -1.45660715e-05, %v968_v36  ;;  %v979_v45 = vmul.f32 %v971_v38, %v971_v38 }
  0xeb   : > { %v457_v46 = vadd.f32 -2.101024e-06, %v453_v39  ;;  %v505_v47 = vadd.f32 -0.001682827, %v501_v40  ;;  %v451_v48 = vmul.f32 %v447_v41, %v960_v30  ;;  %v450_v49 = vadd.f32 2.7706815e-08, %v446_v42 }
  0xec   : > { %v499_v50 = vmul.f32 %v495_v43, %v960_v30  ;;  %v498_v51 = vadd.f32 -0.00021337405, %v494_v44  ;;  %v444_v52 = vmul.f32 -2.7261424e-10, %v979_v45  ;;  %v492_v53 = vmul.f32 -1.45660715e-05, %v979_v45 }
  0xed   : > { %v461_v54 = vmul.f32 %v457_v46, %v949_v23  ;;  %v509_v55 = vmul.f32 %v505_v47, %v949_v23  ;;  %v455_v56 = vadd.f32 -2.101024e-06, %v451_v48  ;;  %v454_v57 = vmul.f32 %v450_v49, %v968_v36 }
  0xee   : > { %v503_v58 = vadd.f32 -0.001682827, %v499_v50  ;;  %v502_v59 = vmul.f32 %v498_v51, %v968_v36  ;;  %v448_v60 = vadd.f32 2.7706815e-08, %v444_v52  ;;  %v496_v61 = vadd.f32 -0.00021337405, %v492_v53 }
  0xef   : > { %v465_v62 = vadd.f32 -5.6925062e-05, %v461_v54  ;;  %v513_v63 = vadd.f32 -0.0073733293, %v509_v55  ;;  %v459_v0 = vmul.f32 %v455_v56, %v960_v30  ;;  %v458_v1 = vadd.f32 -2.101024e-06, %v454_v57 }
  0xf0   : > { %v507_v2 = vmul.f32 %v503_v58, %v960_v30  ;;  %v506_v3 = vadd.f32 -0.001682827, %v502_v59  ;;  %v452_v4 = vmul.f32 %v448_v60, %v979_v45  ;;  %v500_v5 = vmul.f32 %v496_v61, %v979_v45 }
  0xf1   : > { %v469_v6 = vmul.f32 %v465_v62, %v949_v23  ;;  %v517_v7 = vmul.f32 %v513_v63, %v949_v23  ;;  %v463_v8 = vadd.f32 -5.6925062e-05, %v459_v0  ;;  %v462_v9 = vmul.f32 %v458_v1, %v968_v36 }
  0xf2   : > { %v511_v10 = vadd.f32 -0.0073733293, %v507_v2  ;;  %v510_v11 = vmul.f32 %v506_v3, %v968_v36  ;;  %v456_v12 = vadd.f32 -2.101024e-06, %v452_v4  ;;  %v504_v14 = vadd.f32 -0.001682827, %v500_v5 }
  0xf3   : > { %v473_v15 = vadd.f32 -0.00073499064, %v469_v6  ;;  %v521_v16 = vadd.f32 -0.014264739, %v517_v7  ;;  %v467_v18 = vmul.f32 %v463_v8, %v960_v30  ;;  %v466_v20 = vadd.f32 -5.6925062e-05, %v462_v9 }
  0xf4   : > { %v515_v22 = vmul.f32 %v511_v10, %v960_v30  ;;  %v514_v24 = vadd.f32 -0.0073733293, %v510_v11  ;;  %v460_v26 = vmul.f32 %v456_v12, %v979_v45  ;;  %v508_v28 = vmul.f32 %v504_v14, %v979_v45 }
  0xf5   : > { %v477_v29 = vmul.f32 %v473_v15, %v949_v23  ;;  %837 = vrcp.f32 %v521_v16  ;;  %v471_v32 = vadd.f32 -0.00073499064, %v467_v18  ;;  %v470_v33 = vmul.f32 %v466_v20, %v968_v36  ;;  %v546_v18 = vld [vmem:[%s1081_s3 + $0x18] sm:$0xff] }
  0xf6   : > { %v519_v34 = vadd.f32 -0.014264739, %v515_v22  ;;  %v518_v35 = vmul.f32 %v514_v24, %v968_v36  ;;  %v464_v37 = vadd.f32 -5.6925062e-05, %v460_v26  ;;  %v512_v39 = vadd.f32 -0.0073733293, %v508_v28 }
  0xf7   : > { %v481_v40 = vadd.f32 -0.0029546, %v477_v29  ;;  %v475_v41 = vmul.f32 %v471_v32, %v960_v30  ;;  %v474_v42 = vadd.f32 -0.00073499064, %v470_v33  ;;  %v423_v4 = vmul.f32 0.5, %v940_v17 }
  0xf8   : > { %839 = vrcp.f32 %v519_v34  ;;  %v522_v43 = vadd.f32 -0.014264739, %v518_v35  ;;  %v468_v44 = vmul.f32 %v464_v37, %v979_v45  ;;  %v516_v46 = vmul.f32 %v512_v39, %v979_v45  ;;  %v625_v34 = vld [vmem:[%s1085_s7] sm:$0x7] }
  0xf9   : > { %v479_v47 = vadd.f32 -0.0029546, %v475_v41  ;;  %v478_v48 = vmul.f32 %v474_v42, %v968_v36  ;;  %v485_v49 = vmul.f32 %v481_v40, %v949_v23  ;;  %v424_v17 = vmul.f32 0.5, %v954_v27 }
  0xfa   : > { %841 = vrcp.f32 %v522_v43  ;;  %v472_v50 = vadd.f32 -0.00073499064, %v468_v44  ;;  %v520_v51 = vadd.f32 -0.014264739, %v516_v46 }
  0xfb   : > { %v482_v52 = vadd.f32 -0.0029546, %v478_v48  ;;  %v483_v53 = vmul.f32 %v479_v47, %v960_v30  ;;  %v489_v55 = vadd.f32 -0.016096033, %v485_v49 }
  0xfc   : > { %v476_v54 = vmul.f32 %v472_v50, %v979_v45  ;;  %843 = vrcp.f32 %v520_v51 }
  0xfd   : > { %v486_v56 = vmul.f32 %v482_v52, %v968_v36  ;;  %v487_v58 = vadd.f32 -0.016096033, %v483_v53  ;;  %v525_v61 = vmul.f32 %v942_v19, %v489_v55  ;;  %v425_v19 = vmul.f32 0.5, %v937_v13  ;;  %v545_v13 = vld [vmem:[%s1081_s3 + $0x10] sm:$0xff] }
  0xfe   : > { %v480_v57 = vadd.f32 -0.0029546, %v476_v54 }
  0xff   : > { %v490_v23 = vadd.f32 -0.016096033, %v486_v56  ;;  %v523_v63 = vmul.f32 %v951_v25, %v487_v58  ;;  %v543_v25 = vld [vmem:[%s1081_s3] sm:$0xff] }
 0x100   : > { %v484_v59 = vmul.f32 %v480_v57, %v979_v45 }
 0x101   : > { %v526_v2 = vmul.f32 %v962_v31, %v490_v23  ;;  %v426_v31 = vmul.f32 0.5, %v945_v21 }
 0x102   : > { %v838_v60 = vpop.eup %837  ;;  %v488_v0 = vadd.f32 -0.016096033, %v484_v59 }
 0x103   : > { %v533_v62 = vmul.f32 %v838_v60, %v525_v61 }
 0x104   : > { %v524_v45 = vmul.f32 %v971_v38, %v488_v0  ;;  %v544_v38 = vld [vmem:[%s1081_s3 + $0x8] sm:$0xff] }
 0x105   : > { %v840_v1 = vpop.eup %839  ;;  %v537_v36 = vadd.f32 1.0, %v533_v62 }
 0x106   : > { %v531_v30 = vmul.f32 %v840_v1, %v523_v63  ;;  %v856_v1 = vmov 0.0  }
 0x107   : > { %v842_v3 = vpop.eup %841  ;;  %v541_v11 = vmul.f32 %v537_v36, %v425_v19  ;;  %801 = vmatprep.subr.mxu1 %v856_v1  ;;  %809 = vmatprep.mubr.msk.f32.mxu1 %vm857_vm2, %v856_v1 }
 0x108   : > { %v535_v5 = vadd.f32 1.0, %v531_v30  ;;  %v534_v6 = vmul.f32 %v842_v3, %v526_v2 }
 0x109   : > { %v844_v7 = vpop.eup %843  ;;  %v549_v21 = vadd.f32 %v545_v13, %v541_v11  ;;  %v617_v13 = vld [vmem:[%s1083_s5 + $0x8] sm:$0xff] }
 0x10a   : > { %v539_v8 = vmul.f32 %v535_v5, %v423_v4  ;;  %v538_v9 = vadd.f32 1.0, %v534_v6  ;;  %v532_v10 = vmul.f32 %v844_v7, %v524_v45  ;;  %v610_v5 = vld [vmem:[%s1082_s4 + $0x10] sm:$0xff]  ;;  %v611_v6 = vld [vmem:[%s1082_s4 + $0x18] sm:$0xff] }
 0x10b   : > { %v555_v28 = vsel %vm551_vm1, %v549_v21, 0.0 }
 0x10c   : > { %v536_v12 = vadd.f32 1.0, %v532_v10  ;;  %v547_v14 = vadd.f32 %v543_v25, %v539_v8  ;;  %v542_v15 = vmul.f32 %v538_v9, %v426_v31  ;;  %v609_v8 = vld [vmem:[%s1082_s4 + $0x8] sm:$0xff]  ;;  %v619_v9 = vld [vmem:[%s1083_s5 + $0x18] sm:$0xff]  ;;  %v608_v31 = vld [vmem:[%s1082_s4] sm:$0xff] }
 0x10e   : > { %v540_v16 = vmul.f32 %v536_v12, %v424_v17  ;;  %v550_v27 = vadd.f32 %v546_v18, %v542_v15  ;;  %v552_v22 = vsel %vm551_vm1, %v547_v14, 0.0  ;;  %v618_v17 = vld [vmem:[%s1083_s5 + $0x10] sm:$0xff] }
 0x110   : > { %v548_v20 = vadd.f32 %v544_v38, %v540_v16  ;;  %v557_v32 = vsel %vm551_vm1, %v550_v27, 0.0  ;;  %v616_v16 = vld [vmem:[%s1083_s5] sm:$0xff] }
 0x112   : > { %v553_v24 = vsel %vm551_vm1, %v548_v20, 0.0 }
 0x113   : > { %v554_v26 = vadd.f32 %v553_v24, %v552_v22 }
 0x115   : > { %v556_v29 = vadd.f32 %v555_v28, %v554_v26 }
 0x117   : > { %v558_v33 = vadd.f32 %v557_v32, %v556_v29 }
 0x119   : > { %559 = vadd.xlane.f32.xlu0 %v558_v33 }
 0x12f   : > { %628 = vperm.xlu0 %830, %v625_v34  }
 0x1a2   : > { %v560_v35 = vpop.xlane.xlu0 %559 }
 0x1a3   : > { %v561_v37 = vrot.slane %v560_v35, 4 }
 0x1a5   : > { %v562_v39 = vadd.f32 %v561_v37, %v560_v35 }
 0x1a7   : > { %v563_v40 = vrot.slane %v562_v39, 2 }
 0x1a9   : > { %v564_v41 = vadd.f32 %v563_v40, %v562_v39 }
 0x1ab   : > { %v565_v42 = vrot.slane %v564_v41, 1 }
 0x1ad   : > { %v566_v43 = vadd.f32 %v565_v42, %v564_v41 }
 0x1af   : > { %813 = vpush %v566_v43 }
 0x1e0   : > { %s814_s13 = spop %813 }
 0x1e1   : > { %s570_s14 = smul.f32 0.00048828125, %s814_s13 }
 0x1e3   : > { %v571_v44 = vstv %s570_s14 }
 0x1e4   : > { %v572_v46 = vsub.f32 %v547_v14, %v571_v44  ;;  %v573_v47 = vsub.f32 %v548_v20, %v571_v44  ;;  %v574_v48 = vsub.f32 %v549_v21, %v571_v44  ;;  %v575_v49 = vsub.f32 %v550_v27, %v571_v44  ;;  %v624_v21 = vld [vmem:[%s1084_s6] sm:$0x7]  ;;  %v629_v27 = vpop.permute.xlu0 %628 }
 0x1e6   : > { %v576_v50 = vmul.f32 %v572_v46, %v572_v46  ;;  %v577_v51 = vmul.f32 %v573_v47, %v573_v47  ;;  %v578_v52 = vmul.f32 %v574_v48, %v574_v48  ;;  %v579_v53 = vmul.f32 %v575_v49, %v575_v49 }
 0x1e8   : > { %v580_v54 = vsel %vm551_vm1, %v576_v50, 0.0  ;;  %v581_v55 = vsel %vm551_vm1, %v577_v51, 0.0  ;;  %v583_v57 = vsel %vm551_vm1, %v578_v52, 0.0  ;;  %v585_v59 = vsel %vm551_vm1, %v579_v53, 0.0 }
 0x1e9   : > { %v582_v56 = vadd.f32 %v581_v55, %v580_v54 }
 0x1eb   : > { %v584_v58 = vadd.f32 %v583_v57, %v582_v56 }
 0x1ed   : > { %v586_v60 = vadd.f32 %v585_v59, %v584_v58 }
 0x1ef   : > { %587 = vadd.xlane.f32.xlu1 %v586_v60 }
 0x278   : > { %v588_v61 = vpop.xlane.xlu1 %587 }
 0x279   : > { %v589_v23 = vrot.slane %v588_v61, 4 }
 0x27b   : > { %v590_v62 = vadd.f32 %v589_v23, %v588_v61 }
 0x27d   : > { %v591_v63 = vrot.slane %v590_v62, 2 }
 0x27f   : > { %v592_v0 = vadd.f32 %v591_v63, %v590_v62 }
 0x281   : > { %v593_v30 = vrot.slane %v592_v0, 1 }
 0x283   : > { %v594_v2 = vadd.f32 %v593_v30, %v592_v0 }
 0x285   : > { %815 = vpush %v594_v2 }
 0x2b6   : > { %s816_s15 = spop %815 }
 0x2b7   : > { %s598_s16 = smul.f32 0.00048828125, %s816_s15 }
 0x2b9   : > { %s599_s17 = sadd.f32 1e-05, %s598_s16 }
 0x2bb   : > { %v600_v3 = vstv %s599_s17  ;;  %s766_s17 = sshll.u32 %s1088_s28, 2 }
 0x2bc   : > { %845 = vrsqrt.f32 %v600_v3  ;;  %s303_s20 = scalar_lea.vmem %s1086_s8, %s766_s17 }
 0x2c9   : > { %v846_v4 = vpop.eup %845 }
 0x2ca   : > { %817 = vpush %v846_v4 }
 0x2fb   : > { %s818_s18 = spop %817 }
 0x2fc   : > { %v603_v36 = vstv %s818_s18 }
 0x2fd   : > { %v605_v45 = vmul.f32 %v603_v36, %v573_v47  ;;  %v606_v7 = vmul.f32 %v603_v36, %v574_v48  ;;  %v607_v19 = vmul.f32 %v603_v36, %v575_v49  ;;  %v604_v10 = vmul.f32 %v603_v36, %v572_v46 }
 0x2ff   : > { %v614_v25 = vmul.f32 %v610_v5, %v606_v7  ;;  %v615_v11 = vmul.f32 %v611_v6, %v607_v19  ;;  %v613_v12 = vmul.f32 %v609_v8, %v605_v45  ;;  %v612_v14 = vmul.f32 %v608_v31, %v604_v10 }
 0x301   : > { %v623_v38 = vadd.f32 %v619_v9, %v615_v11  ;;  %v622_v15 = vadd.f32 %v618_v17, %v614_v25  ;;  %v621_v18 = vadd.f32 %v617_v13, %v613_v12  ;;  %v620_v20 = vadd.f32 %v616_v16, %v612_v14 }
 0x303   : > { %802 = vmatpush3.msra.mxu1 %v623_v38 }
 0x304   : > { %803 = vmatprep.subr.mxu1 %v856_v1 }
 0x305   : > { %804 = vmatpush3.msra.mxu1 %v622_v15 }
 0x306   : > { %805 = vmatprep.subr.mxu1 %v856_v1 }
 0x307   : > { %806 = vmatpush3.msra.mxu1 %v621_v18 }
 0x308   : > { %807 = vmatprep.subr.mxu1 %v856_v1 }
 0x309   : > { %808 = vmatpush3.msra.mxu1 %v620_v20 }
 0x30a   : > { %810 = vmatmul.mubr.msk.f32.vlgmr.msra.gmra.mxu1 %vm631_vm3, %v624_v21 }
 0x3ca   : > { %v701_v22 = vpop.f32.mrf.mxu1 }
 0x3cb   : > { %v702_v24 = vadd.f32 %v701_v22, %v629_v27 }
 0x3cc   : > { %v811_v26 = vpop.f32.mrf.mxu1 }
 0x3cd   : > { %706 = vst.msk [vmem:[%s303_s20] sm:$0x7] %vm705_vm4, %v702_v24 }
 0x3ce PF: > { %s18_s27 = sadd.s32 1, %s853_s27  }
 0x3cf   : > { %p15_p4 = scmp.ge.s32.totalorder %s18_s27, 4  }
 0x3d1   :  { %17 = sbr.rel (!%p15_p4) target bundleno = 1 (0x1), region = 82 }

</bundles_post_ra>
